<compile_context>
chip_gen: v7x
topology: tpu7x:2x2x1
jax: 0.10.0
libtpu: 0.0.40
codegen_flags: <defaults>
</compile_context>

<pallas_src>
import numpy as np
import jax
import jax.numpy as jnp
from jax.experimental import pallas as pl
from jax.experimental.pallas import tpu as pltpu

EPS = 1e-5


def compute_groups(channels, groups=8):
    g = min(groups, channels)
    while channels % g != 0 and g > 1:
        g -= 1
    return g


def group_avg_matrix(C, G):
    """(C, C) matrix that averages per-channel stats within each GroupNorm group."""
    cpg = C // G
    ch = np.arange(C)
    same = (ch[:, None] // cpg) == (ch[None, :] // cpg)
    return jnp.asarray(same.astype(np.float32) / cpg)


def _residual_block_kernel(
    x_ref,    # (1, L, Cin)      bf16  one batch element, channels-last
    t_ref,    # (1, 1, T)        f32   time embedding
    g1_ref,   # (1, Cin)         f32   norm1 gamma
    be1_ref,  # (1, Cin)         f32   norm1 beta
    A1_ref,   # (Cin, Cin)       f32   group-average matrix for norm1
    w1_ref,   # (3, Cin, Cout)   bf16  conv1 weight (tap, in, out)
    b1_ref,   # (1, Cout)        f32
    wt_ref,   # (T, Cout)        f32   time_mlp linear weight (transposed)
    bt_ref,   # (1, Cout)        f32
    g2_ref,   # (1, Cout)        f32
    be2_ref,  # (1, Cout)        f32
    A2_ref,   # (Cout, Cout)     f32
    w2_ref,   # (3, Cout, Cout)  bf16
    b2_ref,   # (1, Cout)        f32
    ws_ref,   # (Cin, Cout)      bf16  shortcut 1x1 conv weight (transposed)
    bs_ref,   # (1, Cout)        f32
    out_ref,  # (1, L, Cout)     f32
):
    x = x_ref[0]                                   # (L, Cin) bf16
    xf = x.astype(jnp.float32)

    def group_norm(h, A, gamma, beta):
        # h: (L, C) f32.  Centered two-pass stats (matches nn.GroupNorm, eps=1e-5).
        mu_c = jnp.mean(h, axis=0, keepdims=True)                        # (1, C)
        mu_g = jnp.dot(mu_c, A, preferred_element_type=jnp.float32)      # (1, C)
        d = h - mu_g
        var_c = jnp.mean(d * d, axis=0, keepdims=True)                   # (1, C)
        var_g = jnp.dot(var_c, A, preferred_element_type=jnp.float32)    # (1, C)
        inv = jax.lax.rsqrt(var_g + EPS)
        return d * (inv * gamma) + beta

    def silu(h):
        return h * jax.nn.sigmoid(h)               # logistic/exp lands on the EUP

    def conv3(h, w_ref_, b):
        # h: (L, C) f32; w_ref_: (3, C, Co) bf16; b: (1, Co) f32.
        # Zero-pad L by one row on each side (single sublane-axis concat); the
        # three taps are sublane-offset slices -> bf16 MXU matmuls, f32 accum.
        L, C = h.shape
        zrow = jnp.zeros((1, C), dtype=h.dtype)
        hp = jnp.concatenate([zrow, h, zrow], axis=0)            # (L+2, C) f32
        y = jnp.dot(hp[0:L].astype(jnp.bfloat16), w_ref_[0],
                    preferred_element_type=jnp.float32)
        y = y + jnp.dot(hp[1:L + 1].astype(jnp.bfloat16), w_ref_[1],
                        preferred_element_type=jnp.float32)
        y = y + jnp.dot(hp[2:L + 2].astype(jnp.bfloat16), w_ref_[2],
                        preferred_element_type=jnp.float32)
        return y + b

    # --- norm1 -> SiLU -> conv1 ---
    h = group_norm(xf, A1_ref[...], g1_ref[...], be1_ref[...])
    h = silu(h)
    h = conv3(h, w1_ref, b1_ref[...])

    # --- time embedding: SiLU -> Linear, broadcast over L ---
    t = t_ref[0].astype(jnp.float32)                             # (1, T)
    te = silu(t)
    te = jnp.dot(te, wt_ref[...], preferred_element_type=jnp.float32) + bt_ref[...]
    h = h + te                                                   # (1, Co) -> (L, Co)

    # --- norm2 -> SiLU -> dropout(identity, eval) -> conv2 ---
    h = group_norm(h, A2_ref[...], g2_ref[...], be2_ref[...])
    h = silu(h)
    # TODO(synk): nn.Dropout is identity in eval mode; training-mode RNG dropout
    # (pltpu.prng_*) is not implemented here.
    h = conv3(h, w2_ref, b2_ref[...])

    # --- shortcut (1x1 conv) and residual add ---
    sc = jnp.dot(x, ws_ref[...], preferred_element_type=jnp.float32) + bs_ref[...]
    out_ref[0] = (h + sc).astype(out_ref.dtype)


def prepare_params(p, in_channels, out_channels, groups=8):
    """One-time weight re-layout + dtype conversion (keep out of the hot path)."""
    f32, bf16 = jnp.float32, jnp.bfloat16
    G1 = compute_groups(in_channels, groups)
    G2 = compute_groups(out_channels, groups)
    if 'ws' in p:                                   # Conv1d(in, out, 1) shortcut
        ws = jnp.asarray(p['ws'])[:, :, 0].T.astype(bf16)            # (Cin, Cout)
        bs = jnp.asarray(p['bs']).reshape(1, -1).astype(f32)
    else:                                           # nn.Identity shortcut
        ws = jnp.eye(in_channels, out_channels, dtype=bf16)
        bs = jnp.zeros((1, out_channels), f32)
    return dict(
        g1=jnp.asarray(p['gamma1']).reshape(1, -1).astype(f32),
        be1=jnp.asarray(p['beta1']).reshape(1, -1).astype(f32),
        A1=group_avg_matrix(in_channels, G1),
        w1=jnp.transpose(jnp.asarray(p['w1']), (2, 1, 0)).astype(bf16),  # (3,Cin,Cout)
        b1=jnp.asarray(p['b1']).reshape(1, -1).astype(f32),
        wt=jnp.asarray(p['wt']).T.astype(f32),                           # (T, Cout)
        bt=jnp.asarray(p['bt']).reshape(1, -1).astype(f32),
        g2=jnp.asarray(p['gamma2']).reshape(1, -1).astype(f32),
        be2=jnp.asarray(p['beta2']).reshape(1, -1).astype(f32),
        A2=group_avg_matrix(out_channels, G2),
        w2=jnp.transpose(jnp.asarray(p['w2']), (2, 1, 0)).astype(bf16),  # (3,Cout,Cout)
        b2=jnp.asarray(p['b2']).reshape(1, -1).astype(f32),
        ws=ws, bs=bs,
    )


@jax.jit
def residual_block_pallas(x_ncl, time_emb, prepped):
    """x_ncl: (B, C_in, L) f32 (PyTorch layout); time_emb: (B, T). Returns (B, C_out, L) f32."""
    B, C_in, L = x_ncl.shape
    T = time_emb.shape[1]
    C_out = prepped['b1'].shape[-1]

    # Glue: channels-last + bf16 for the kernel (transpose and cast fuse into one
    # XLA op).  In a channels-last model these boundary transposes disappear.
    x_blc = jnp.transpose(x_ncl, (0, 2, 1)).astype(jnp.bfloat16)   # (B, L, Cin)
    t3 = time_emb[:, None, :].astype(jnp.float32)                  # (B, 1, T)

    const2 = lambda b: (0, 0)
    const3 = lambda b: (0, 0, 0)
    in_specs = [
        pl.BlockSpec((1, L, C_in), lambda b: (b, 0, 0)),      # x (per-batch block)
        pl.BlockSpec((1, 1, T), lambda b: (b, 0, 0)),         # time_emb
        pl.BlockSpec((1, C_in), const2),                      # gamma1
        pl.BlockSpec((1, C_in), const2),                      # beta1
        pl.BlockSpec((C_in, C_in), const2),                   # A1
        pl.BlockSpec((3, C_in, C_out), const3),               # w1
        pl.BlockSpec((1, C_out), const2),                     # b1
        pl.BlockSpec((T, C_out), const2),                     # wt
        pl.BlockSpec((1, C_out), const2),                     # bt
        pl.BlockSpec((1, C_out), const2),                     # gamma2
        pl.BlockSpec((1, C_out), const2),                     # beta2
        pl.BlockSpec((C_out, C_out), const2),                 # A2
        pl.BlockSpec((3, C_out, C_out), const3),              # w2
        pl.BlockSpec((1, C_out), const2),                     # b2
        pl.BlockSpec((C_in, C_out), const2),                  # ws
        pl.BlockSpec((1, C_out), const2),                     # bs
    ]

    out_blc = pl.pallas_call(
        _residual_block_kernel,
        out_shape=jax.ShapeDtypeStruct((B, L, C_out), jnp.float32),
        grid=(B,),
        in_specs=in_specs,
        out_specs=pl.BlockSpec((1, L, C_out), lambda b: (b, 0, 0)),
        compiler_params=pltpu.CompilerParams(
            dimension_semantics=("parallel",),      # shard batch across TCs (v7x)
            vmem_limit_bytes=48 * 1024 * 1024,      # stays under v7x 64 MiB physical
        ),
    )(
        x_blc, t3,
        prepped['g1'], prepped['be1'], prepped['A1'],
        prepped['w1'], prepped['b1'],
        prepped['wt'], prepped['bt'],
        prepped['g2'], prepped['be2'], prepped['A2'],
        prepped['w2'], prepped['b2'],
        prepped['ws'], prepped['bs'],
    )
    return jnp.transpose(out_blc, (0, 2, 1))                   # back to (B, Cout, L)


def residual_block_reference(x_ncl, time_emb, params, G1, G2):
    """Pure-JAX f32 reference with PyTorch (NCL) semantics, for validation."""
    def gn(h, G, gamma, beta):
        B, C, L = h.shape
        hr = h.reshape(B, G, -1)
        mu = hr.mean(-1, keepdims=True)
        var = ((hr - mu) ** 2).mean(-1, keepdims=True)
        hn = ((hr - mu) / jnp.sqrt(var + EPS)).reshape(B, C, L)
        return hn * gamma[None, :, None] + beta[None, :, None]

    def conv1d(h, w, b):
        o = jax.lax.conv_general_dilated(h, w, (1,), ((1, 1),),
                                         dimension_numbers=('NCH', 'OIH', 'NCH'))
        return o + b[None, :, None]

    h = gn(x_ncl, G1, params['gamma1'], params['beta1'])
    h = jax.nn.silu(h)
    h = conv1d(h, params['w1'], params['b1'])
    te = jax.nn.silu(time_emb) @ params['wt'].T + params['bt']
    h = h + te[:, :, None]
    h = gn(h, G2, params['gamma2'], params['beta2'])
    h = jax.nn.silu(h)
    h = conv1d(h, params['w2'], params['b2'])
    sc = jnp.einsum('oc,bcl->bol', params['ws'][:, :, 0], x_ncl) + params['bs'][None, :, None]
    return h + sc


if __name__ == "__main__":
    B, C_in, C_out, L, T = 2, 4, 8, 16, 32

    G1 = compute_groups(C_in)    # 4
    G2 = compute_groups(C_out)   # 8

    key = jax.random.PRNGKey(0)
    ks = jax.random.split(key, 12)

    x = jax.random.normal(ks[0], (B, C_in, L), dtype=jnp.float32)
    time_emb = jax.random.normal(ks[1], (B, T), dtype=jnp.float32)

    params = {
        'gamma1': 1.0 + 0.1 * jax.random.normal(ks[2], (C_in,), jnp.float32),
        'beta1': 0.1 * jax.random.normal(ks[3], (C_in,), jnp.float32),
        'w1': 0.2 * jax.random.normal(ks[4], (C_out, C_in, 3), jnp.float32),
        'b1': 0.1 * jax.random.normal(ks[5], (C_out,), jnp.float32),
        'wt': 0.2 * jax.random.normal(ks[6], (C_out, T), jnp.float32),
        'bt': 0.1 * jax.random.normal(ks[7], (C_out,), jnp.float32),
        'gamma2': 1.0 + 0.1 * jax.random.normal(ks[8], (C_out,), jnp.float32),
        'beta2': 0.1 * jax.random.normal(ks[9], (C_out,), jnp.float32),
        'w2': 0.2 * jax.random.normal(ks[10], (C_out, C_out, 3), jnp.float32),
        'b2': 0.1 * jax.random.normal(ks[11], (C_out,), jnp.float32),
        'ws': 0.3 * jax.random.normal(jax.random.fold_in(key, 99), (C_out, C_in, 1), jnp.float32),
        'bs': 0.1 * jax.random.normal(jax.random.fold_in(key, 100), (C_out,), jnp.float32),
    }

    prepped = prepare_params(params, C_in, C_out)   # one-time layout/dtype prep

    out = residual_block_pallas(x, time_emb, prepped)
    out = jax.block_until_ready(out)

    ref = residual_block_reference(x, time_emb, params, G1, G2)
    ref = jax.block_until_ready(ref)

    assert out.shape == (B, C_out, L), out.shape
    # Conv/shortcut matmuls use bf16 inputs (f32 accumulation) per the perf
    # review, so compare against the pure-f32 reference at bf16 tolerance.
    np.testing.assert_allclose(np.asarray(out), np.asarray(ref), rtol=5e-2, atol=5e-2)

    print("KERNEL_OK")
</pallas_src>

<mosaic_0001>
module attributes {stable_mosaic.version = 11 : i64} {
  func.func @_residual_block_kernel(%arg0: i32, %arg1: memref<1x16x4xbf16, #tpu.memory_space<vmem>>, %arg2: memref<1x1x32xf32, #tpu.memory_space<vmem>>, %arg3: memref<1x4xf32, #tpu.memory_space<vmem>>, %arg4: memref<1x4xf32, #tpu.memory_space<vmem>>, %arg5: memref<4x4xf32, #tpu.memory_space<vmem>>, %arg6: memref<3x4x8xbf16, #tpu.memory_space<vmem>>, %arg7: memref<1x8xf32, #tpu.memory_space<vmem>>, %arg8: memref<32x8xf32, #tpu.memory_space<vmem>>, %arg9: memref<1x8xf32, #tpu.memory_space<vmem>>, %arg10: memref<1x8xf32, #tpu.memory_space<vmem>>, %arg11: memref<1x8xf32, #tpu.memory_space<vmem>>, %arg12: memref<8x8xf32, #tpu.memory_space<vmem>>, %arg13: memref<3x8x8xbf16, #tpu.memory_space<vmem>>, %arg14: memref<1x8xf32, #tpu.memory_space<vmem>>, %arg15: memref<4x8xbf16, #tpu.memory_space<vmem>>, %arg16: memref<1x8xf32, #tpu.memory_space<vmem>>, %arg17: memref<1x16x8xf32, #tpu.memory_space<vmem>>) attributes {dimension_semantics = [#tpu.dimension_semantics<parallel>], iteration_bounds = array<i64: 2>, scalar_prefetch = 0 : i64, scratch_operands = 0 : i64, tpu.core_type = #tpu.core_type<tc>, window_params = [{transform_indices = @transform_0, window_bounds = array<i64: 1, 16, 4>}, {transform_indices = @transform_1, window_bounds = array<i64: 1, 1, 32>}, {pipeline_mode = #tpu.pipeline_mode<synchronous>, transform_indices = @transform_2, window_bounds = array<i64: 1, 4>}, {pipeline_mode = #tpu.pipeline_mode<synchronous>, transform_indices = @transform_3, window_bounds = array<i64: 1, 4>}, {pipeline_mode = #tpu.pipeline_mode<synchronous>, transform_indices = @transform_4, window_bounds = array<i64: 4, 4>}, {pipeline_mode = #tpu.pipeline_mode<synchronous>, transform_indices = @transform_5, window_bounds = array<i64: 3, 4, 8>}, {pipeline_mode = #tpu.pipeline_mode<synchronous>, transform_indices = @transform_6, window_bounds = array<i64: 1, 8>}, {pipeline_mode = #tpu.pipeline_mode<synchronous>, transform_indices = @transform_7, window_bounds = array<i64: 32, 8>}, {pipeline_mode = #tpu.pipeline_mode<synchronous>, transform_indices = @transform_8, window_bounds = array<i64: 1, 8>}, {pipeline_mode = #tpu.pipeline_mode<synchronous>, transform_indices = @transform_9, window_bounds = array<i64: 1, 8>}, {pipeline_mode = #tpu.pipeline_mode<synchronous>, transform_indices = @transform_10, window_bounds = array<i64: 1, 8>}, {pipeline_mode = #tpu.pipeline_mode<synchronous>, transform_indices = @transform_11, window_bounds = array<i64: 8, 8>}, {pipeline_mode = #tpu.pipeline_mode<synchronous>, transform_indices = @transform_12, window_bounds = array<i64: 3, 8, 8>}, {pipeline_mode = #tpu.pipeline_mode<synchronous>, transform_indices = @transform_13, window_bounds = array<i64: 1, 8>}, {pipeline_mode = #tpu.pipeline_mode<synchronous>, transform_indices = @transform_14, window_bounds = array<i64: 4, 8>}, {pipeline_mode = #tpu.pipeline_mode<synchronous>, transform_indices = @transform_15, window_bounds = array<i64: 1, 8>}, {transform_indices = @transform_16, window_bounds = array<i64: 1, 16, 8>}]} {
    %c0 = arith.constant 0 : index
    %c0_0 = arith.constant 0 : index
    %c0_1 = arith.constant 0 : index
    %0 = vector.load %arg1[%c0, %c0_0, %c0_1] : memref<1x16x4xbf16, #tpu.memory_space<vmem>>, vector<1x16x4xbf16>
    %1 = vector.shape_cast %0 : vector<1x16x4xbf16> to vector<16x4xbf16>
    %2 = arith.extf %1 : vector<16x4xbf16> to vector<16x4xf32>
    %c0_2 = arith.constant 0 : index
    %c0_3 = arith.constant 0 : index
    %3 = vector.load %arg5[%c0_2, %c0_3] : memref<4x4xf32, #tpu.memory_space<vmem>>, vector<4x4xf32>
    %c0_4 = arith.constant 0 : index
    %c0_5 = arith.constant 0 : index
    %4 = vector.load %arg3[%c0_4, %c0_5] : memref<1x4xf32, #tpu.memory_space<vmem>>, vector<1x4xf32>
    %c0_6 = arith.constant 0 : index
    %c0_7 = arith.constant 0 : index
    %5 = vector.load %arg4[%c0_6, %c0_7] : memref<1x4xf32, #tpu.memory_space<vmem>>, vector<1x4xf32>
    %cst = arith.constant dense<0.000000e+00> : vector<4xf32>
    %6 = vector.multi_reduction <add>, %2, %cst [0] : vector<16x4xf32> to vector<4xf32>
    %7 = vector.shape_cast %6 : vector<4xf32> to vector<1x4xf32>
    %cst_8 = arith.constant 1.600000e+01 : f32
    %8 = vector.broadcast %cst_8 : f32 to vector<1x4xf32>
    %9 = arith.divf %7, %8 : vector<1x4xf32>
    %cst_9 = arith.constant dense<0.000000e+00> : vector<1x4xf32>
    %10 = tpu.matmul %9, %3, %cst_9 {dimension_numbers = #tpu.dot_dimension_numbers<[1], [0], [0], [1], [0, 0, 1, 1], [], []>} : vector<1x4xf32>, vector<4x4xf32>, vector<1x4xf32> -> vector<1x4xf32>
    %11 = vector.broadcast %10 : vector<1x4xf32> to vector<16x4xf32>
    %12 = arith.subf %2, %11 : vector<16x4xf32>
    %13 = arith.mulf %12, %12 : vector<16x4xf32>
    %cst_10 = arith.constant dense<0.000000e+00> : vector<4xf32>
    %14 = vector.multi_reduction <add>, %13, %cst_10 [0] : vector<16x4xf32> to vector<4xf32>
    %15 = vector.shape_cast %14 : vector<4xf32> to vector<1x4xf32>
    %cst_11 = arith.constant 1.600000e+01 : f32
    %16 = vector.broadcast %cst_11 : f32 to vector<1x4xf32>
    %17 = arith.divf %15, %16 : vector<1x4xf32>
    %cst_12 = arith.constant dense<0.000000e+00> : vector<1x4xf32>
    %18 = tpu.matmul %17, %3, %cst_12 {dimension_numbers = #tpu.dot_dimension_numbers<[1], [0], [0], [1], [0, 0, 1, 1], [], []>} : vector<1x4xf32>, vector<4x4xf32>, vector<1x4xf32> -> vector<1x4xf32>
    %cst_13 = arith.constant 9.99999974E-6 : f32
    %19 = vector.broadcast %cst_13 : f32 to vector<1x4xf32>
    %20 = arith.addf %18, %19 : vector<1x4xf32>
    %21 = math.rsqrt %20 : vector<1x4xf32>
    %22 = arith.mulf %21, %4 : vector<1x4xf32>
    %23 = vector.broadcast %22 : vector<1x4xf32> to vector<16x4xf32>
    %24 = arith.mulf %12, %23 : vector<16x4xf32>
    %25 = vector.broadcast %5 : vector<1x4xf32> to vector<16x4xf32>
    %26 = arith.addf %24, %25 : vector<16x4xf32>
    %27 = arith.negf %26 : vector<16x4xf32>
    %28 = math.exp %27 : vector<16x4xf32>
    %cst_14 = arith.constant 1.000000e+00 : f32
    %29 = vector.broadcast %cst_14 : f32 to vector<16x4xf32>
    %30 = arith.addf %29, %28 : vector<16x4xf32>
    %31 = arith.divf %29, %30 : vector<16x4xf32>
    %32 = arith.mulf %26, %31 : vector<16x4xf32>
    %c0_15 = arith.constant 0 : index
    %c0_16 = arith.constant 0 : index
    %33 = vector.load %arg7[%c0_15, %c0_16] : memref<1x8xf32, #tpu.memory_space<vmem>>, vector<1x8xf32>
    %cst_17 = arith.constant 0.000000e+00 : f32
    %34 = vector.broadcast %cst_17 : f32 to vector<1x4xf32>
    %35 = tpu.concatenate %34, %32, %34 in 0 : vector<1x4xf32>, vector<16x4xf32>, vector<1x4xf32> -> vector<18x4xf32>
    %36 = vector.extract_strided_slice %35 {offsets = [0, 0], sizes = [16, 4], strides = [1, 1]} : vector<18x4xf32> to vector<16x4xf32>
    %37 = arith.truncf %36 : vector<16x4xf32> to vector<16x4xbf16>
    %c0_18 = arith.constant 0 : index
    %c0_19 = arith.constant 0 : index
    %c0_20 = arith.constant 0 : index
    %38 = vector.load %arg6[%c0_18, %c0_19, %c0_20] : memref<3x4x8xbf16, #tpu.memory_space<vmem>>, vector<1x4x8xbf16>
    %39 = vector.shape_cast %38 : vector<1x4x8xbf16> to vector<4x8xbf16>
    %cst_21 = arith.constant dense<0.000000e+00> : vector<16x8xf32>
    %40 = tpu.matmul %37, %39, %cst_21 {dimension_numbers = #tpu.dot_dimension_numbers<[1], [0], [0], [1], [0, 0, 1, 1], [], []>} : vector<16x4xbf16>, vector<4x8xbf16>, vector<16x8xf32> -> vector<16x8xf32>
    %41 = vector.extract_strided_slice %35 {offsets = [1, 0], sizes = [16, 4], strides = [1, 1]} : vector<18x4xf32> to vector<16x4xf32>
    %42 = arith.truncf %41 : vector<16x4xf32> to vector<16x4xbf16>
    %c1 = arith.constant 1 : index
    %c0_22 = arith.constant 0 : index
    %c0_23 = arith.constant 0 : index
    %43 = vector.load %arg6[%c1, %c0_22, %c0_23] : memref<3x4x8xbf16, #tpu.memory_space<vmem>>, vector<1x4x8xbf16>
    %44 = vector.shape_cast %43 : vector<1x4x8xbf16> to vector<4x8xbf16>
    %cst_24 = arith.constant dense<0.000000e+00> : vector<16x8xf32>
    %45 = tpu.matmul %42, %44, %cst_24 {dimension_numbers = #tpu.dot_dimension_numbers<[1], [0], [0], [1], [0, 0, 1, 1], [], []>} : vector<16x4xbf16>, vector<4x8xbf16>, vector<16x8xf32> -> vector<16x8xf32>
    %46 = arith.addf %40, %45 : vector<16x8xf32>
    %47 = vector.extract_strided_slice %35 {offsets = [2, 0], sizes = [16, 4], strides = [1, 1]} : vector<18x4xf32> to vector<16x4xf32>
    %48 = arith.truncf %47 : vector<16x4xf32> to vector<16x4xbf16>
    %c2 = arith.constant 2 : index
    %c0_25 = arith.constant 0 : index
    %c0_26 = arith.constant 0 : index
    %49 = vector.load %arg6[%c2, %c0_25, %c0_26] : memref<3x4x8xbf16, #tpu.memory_space<vmem>>, vector<1x4x8xbf16>
    %50 = vector.shape_cast %49 : vector<1x4x8xbf16> to vector<4x8xbf16>
    %cst_27 = arith.constant dense<0.000000e+00> : vector<16x8xf32>
    %51 = tpu.matmul %48, %50, %cst_27 {dimension_numbers = #tpu.dot_dimension_numbers<[1], [0], [0], [1], [0, 0, 1, 1], [], []>} : vector<16x4xbf16>, vector<4x8xbf16>, vector<16x8xf32> -> vector<16x8xf32>
    %52 = arith.addf %46, %51 : vector<16x8xf32>
    %53 = vector.broadcast %33 : vector<1x8xf32> to vector<16x8xf32>
    %54 = arith.addf %52, %53 : vector<16x8xf32>
    %c0_28 = arith.constant 0 : index
    %c0_29 = arith.constant 0 : index
    %c0_30 = arith.constant 0 : index
    %55 = vector.load %arg2[%c0_28, %c0_29, %c0_30] : memref<1x1x32xf32, #tpu.memory_space<vmem>>, vector<1x1x32xf32>
    %56 = vector.shape_cast %55 : vector<1x1x32xf32> to vector<1x32xf32>
    %57 = arith.negf %56 : vector<1x32xf32>
    %58 = math.exp %57 : vector<1x32xf32>
    %cst_31 = arith.constant 1.000000e+00 : f32
    %59 = vector.broadcast %cst_31 : f32 to vector<1x32xf32>
    %60 = arith.addf %59, %58 : vector<1x32xf32>
    %61 = arith.divf %59, %60 : vector<1x32xf32>
    %62 = arith.mulf %56, %61 : vector<1x32xf32>
    %c0_32 = arith.constant 0 : index
    %c0_33 = arith.constant 0 : index
    %63 = vector.load %arg8[%c0_32, %c0_33] : memref<32x8xf32, #tpu.memory_space<vmem>>, vector<32x8xf32>
    %cst_34 = arith.constant dense<0.000000e+00> : vector<1x8xf32>
    %64 = tpu.matmul %62, %63, %cst_34 {dimension_numbers = #tpu.dot_dimension_numbers<[1], [0], [0], [1], [0, 0, 1, 1], [], []>} : vector<1x32xf32>, vector<32x8xf32>, vector<1x8xf32> -> vector<1x8xf32>
    %c0_35 = arith.constant 0 : index
    %c0_36 = arith.constant 0 : index
    %65 = vector.load %arg9[%c0_35, %c0_36] : memref<1x8xf32, #tpu.memory_space<vmem>>, vector<1x8xf32>
    %66 = arith.addf %64, %65 : vector<1x8xf32>
    %67 = vector.broadcast %66 : vector<1x8xf32> to vector<16x8xf32>
    %68 = arith.addf %54, %67 : vector<16x8xf32>
    %c0_37 = arith.constant 0 : index
    %c0_38 = arith.constant 0 : index
    %69 = vector.load %arg12[%c0_37, %c0_38] : memref<8x8xf32, #tpu.memory_space<vmem>>, vector<8x8xf32>
    %c0_39 = arith.constant 0 : index
    %c0_40 = arith.constant 0 : index
    %70 = vector.load %arg10[%c0_39, %c0_40] : memref<1x8xf32, #tpu.memory_space<vmem>>, vector<1x8xf32>
    %c0_41 = arith.constant 0 : index
    %c0_42 = arith.constant 0 : index
    %71 = vector.load %arg11[%c0_41, %c0_42] : memref<1x8xf32, #tpu.memory_space<vmem>>, vector<1x8xf32>
    %cst_43 = arith.constant dense<0.000000e+00> : vector<8xf32>
    %72 = vector.multi_reduction <add>, %68, %cst_43 [0] : vector<16x8xf32> to vector<8xf32>
    %73 = vector.shape_cast %72 : vector<8xf32> to vector<1x8xf32>
    %cst_44 = arith.constant 1.600000e+01 : f32
    %74 = vector.broadcast %cst_44 : f32 to vector<1x8xf32>
    %75 = arith.divf %73, %74 : vector<1x8xf32>
    %cst_45 = arith.constant dense<0.000000e+00> : vector<1x8xf32>
    %76 = tpu.matmul %75, %69, %cst_45 {dimension_numbers = #tpu.dot_dimension_numbers<[1], [0], [0], [1], [0, 0, 1, 1], [], []>} : vector<1x8xf32>, vector<8x8xf32>, vector<1x8xf32> -> vector<1x8xf32>
    %77 = vector.broadcast %76 : vector<1x8xf32> to vector<16x8xf32>
    %78 = arith.subf %68, %77 : vector<16x8xf32>
    %79 = arith.mulf %78, %78 : vector<16x8xf32>
    %cst_46 = arith.constant dense<0.000000e+00> : vector<8xf32>
    %80 = vector.multi_reduction <add>, %79, %cst_46 [0] : vector<16x8xf32> to vector<8xf32>
    %81 = vector.shape_cast %80 : vector<8xf32> to vector<1x8xf32>
    %cst_47 = arith.constant 1.600000e+01 : f32
    %82 = vector.broadcast %cst_47 : f32 to vector<1x8xf32>
    %83 = arith.divf %81, %82 : vector<1x8xf32>
    %cst_48 = arith.constant dense<0.000000e+00> : vector<1x8xf32>
    %84 = tpu.matmul %83, %69, %cst_48 {dimension_numbers = #tpu.dot_dimension_numbers<[1], [0], [0], [1], [0, 0, 1, 1], [], []>} : vector<1x8xf32>, vector<8x8xf32>, vector<1x8xf32> -> vector<1x8xf32>
    %cst_49 = arith.constant 9.99999974E-6 : f32
    %85 = vector.broadcast %cst_49 : f32 to vector<1x8xf32>
    %86 = arith.addf %84, %85 : vector<1x8xf32>
    %87 = math.rsqrt %86 : vector<1x8xf32>
    %88 = arith.mulf %87, %70 : vector<1x8xf32>
    %89 = vector.broadcast %88 : vector<1x8xf32> to vector<16x8xf32>
    %90 = arith.mulf %78, %89 : vector<16x8xf32>
    %91 = vector.broadcast %71 : vector<1x8xf32> to vector<16x8xf32>
    %92 = arith.addf %90, %91 : vector<16x8xf32>
    %93 = arith.negf %92 : vector<16x8xf32>
    %94 = math.exp %93 : vector<16x8xf32>
    %cst_50 = arith.constant 1.000000e+00 : f32
    %95 = vector.broadcast %cst_50 : f32 to vector<16x8xf32>
    %96 = arith.addf %95, %94 : vector<16x8xf32>
    %97 = arith.divf %95, %96 : vector<16x8xf32>
    %98 = arith.mulf %92, %97 : vector<16x8xf32>
    %c0_51 = arith.constant 0 : index
    %c0_52 = arith.constant 0 : index
    %99 = vector.load %arg14[%c0_51, %c0_52] : memref<1x8xf32, #tpu.memory_space<vmem>>, vector<1x8xf32>
    %cst_53 = arith.constant 0.000000e+00 : f32
    %100 = vector.broadcast %cst_53 : f32 to vector<1x8xf32>
    %101 = tpu.concatenate %100, %98, %100 in 0 : vector<1x8xf32>, vector<16x8xf32>, vector<1x8xf32> -> vector<18x8xf32>
    %102 = vector.extract_strided_slice %101 {offsets = [0, 0], sizes = [16, 8], strides = [1, 1]} : vector<18x8xf32> to vector<16x8xf32>
    %103 = arith.truncf %102 : vector<16x8xf32> to vector<16x8xbf16>
    %c0_54 = arith.constant 0 : index
    %c0_55 = arith.constant 0 : index
    %c0_56 = arith.constant 0 : index
    %104 = vector.load %arg13[%c0_54, %c0_55, %c0_56] : memref<3x8x8xbf16, #tpu.memory_space<vmem>>, vector<1x8x8xbf16>
    %105 = vector.shape_cast %104 : vector<1x8x8xbf16> to vector<8x8xbf16>
    %cst_57 = arith.constant dense<0.000000e+00> : vector<16x8xf32>
    %106 = tpu.matmul %103, %105, %cst_57 {dimension_numbers = #tpu.dot_dimension_numbers<[1], [0], [0], [1], [0, 0, 1, 1], [], []>} : vector<16x8xbf16>, vector<8x8xbf16>, vector<16x8xf32> -> vector<16x8xf32>
    %107 = vector.extract_strided_slice %101 {offsets = [1, 0], sizes = [16, 8], strides = [1, 1]} : vector<18x8xf32> to vector<16x8xf32>
    %108 = arith.truncf %107 : vector<16x8xf32> to vector<16x8xbf16>
    %c1_58 = arith.constant 1 : index
    %c0_59 = arith.constant 0 : index
    %c0_60 = arith.constant 0 : index
    %109 = vector.load %arg13[%c1_58, %c0_59, %c0_60] : memref<3x8x8xbf16, #tpu.memory_space<vmem>>, vector<1x8x8xbf16>
    %110 = vector.shape_cast %109 : vector<1x8x8xbf16> to vector<8x8xbf16>
    %cst_61 = arith.constant dense<0.000000e+00> : vector<16x8xf32>
    %111 = tpu.matmul %108, %110, %cst_61 {dimension_numbers = #tpu.dot_dimension_numbers<[1], [0], [0], [1], [0, 0, 1, 1], [], []>} : vector<16x8xbf16>, vector<8x8xbf16>, vector<16x8xf32> -> vector<16x8xf32>
    %112 = arith.addf %106, %111 : vector<16x8xf32>
    %113 = vector.extract_strided_slice %101 {offsets = [2, 0], sizes = [16, 8], strides = [1, 1]} : vector<18x8xf32> to vector<16x8xf32>
    %114 = arith.truncf %113 : vector<16x8xf32> to vector<16x8xbf16>
    %c2_62 = arith.constant 2 : index
    %c0_63 = arith.constant 0 : index
    %c0_64 = arith.constant 0 : index
    %115 = vector.load %arg13[%c2_62, %c0_63, %c0_64] : memref<3x8x8xbf16, #tpu.memory_space<vmem>>, vector<1x8x8xbf16>
    %116 = vector.shape_cast %115 : vector<1x8x8xbf16> to vector<8x8xbf16>
    %cst_65 = arith.constant dense<0.000000e+00> : vector<16x8xf32>
    %117 = tpu.matmul %114, %116, %cst_65 {dimension_numbers = #tpu.dot_dimension_numbers<[1], [0], [0], [1], [0, 0, 1, 1], [], []>} : vector<16x8xbf16>, vector<8x8xbf16>, vector<16x8xf32> -> vector<16x8xf32>
    %118 = arith.addf %112, %117 : vector<16x8xf32>
    %119 = vector.broadcast %99 : vector<1x8xf32> to vector<16x8xf32>
    %120 = arith.addf %118, %119 : vector<16x8xf32>
    %c0_66 = arith.constant 0 : index
    %c0_67 = arith.constant 0 : index
    %121 = vector.load %arg15[%c0_66, %c0_67] : memref<4x8xbf16, #tpu.memory_space<vmem>>, vector<4x8xbf16>
    %cst_68 = arith.constant dense<0.000000e+00> : vector<16x8xf32>
    %122 = tpu.matmul %1, %121, %cst_68 {dimension_numbers = #tpu.dot_dimension_numbers<[1], [0], [0], [1], [0, 0, 1, 1], [], []>} : vector<16x4xbf16>, vector<4x8xbf16>, vector<16x8xf32> -> vector<16x8xf32>
    %c0_69 = arith.constant 0 : index
    %c0_70 = arith.constant 0 : index
    %123 = vector.load %arg16[%c0_69, %c0_70] : memref<1x8xf32, #tpu.memory_space<vmem>>, vector<1x8xf32>
    %124 = vector.broadcast %123 : vector<1x8xf32> to vector<16x8xf32>
    %125 = arith.addf %122, %124 : vector<16x8xf32>
    %126 = arith.addf %120, %125 : vector<16x8xf32>
    %c0_71 = arith.constant 0 : index
    %c0_72 = arith.constant 0 : index
    %c0_73 = arith.constant 0 : index
    %127 = vector.load %arg17[%c0_71, %c0_72, %c0_73] : memref<1x16x8xf32, #tpu.memory_space<vmem>>, vector<1x16x8xf32>
    %128 = vector.shape_cast %127 : vector<1x16x8xf32> to vector<16x8xf32>
    %129 = vector.shape_cast %126 : vector<16x8xf32> to vector<1x16x8xf32>
    tpu.vector_store %arg17[%c0_71, %c0_72, %c0_73], %129 {strides = array<i32>} : memref<1x16x8xf32, #tpu.memory_space<vmem>>, vector<1x16x8xf32>,
    return
  }
  func.func @transform_0(%arg0: i32) -> (i32, i32, i32) {
    %c0_i32 = arith.constant 0 : i32
    %c0_i32_0 = arith.constant 0 : i32
    %c0_i32_1 = arith.constant 0 : i32
    return %arg0, %c0_i32, %c0_i32_0 : i32, i32, i32
  }
  func.func @transform_1(%arg0: i32) -> (i32, i32, i32) {
    %c0_i32 = arith.constant 0 : i32
    %c0_i32_0 = arith.constant 0 : i32
    %c0_i32_1 = arith.constant 0 : i32
    return %arg0, %c0_i32, %c0_i32_0 : i32, i32, i32
  }
  func.func @transform_2(%arg0: i32) -> (i32, i32) {
    %c0_i32 = arith.constant 0 : i32
    %c0_i32_0 = arith.constant 0 : i32
    %c0_i32_1 = arith.constant 0 : i32
    return %c0_i32, %c0_i32_0 : i32, i32
  }
  func.func @transform_3(%arg0: i32) -> (i32, i32) {
    %c0_i32 = arith.constant 0 : i32
    %c0_i32_0 = arith.constant 0 : i32
    %c0_i32_1 = arith.constant 0 : i32
    return %c0_i32, %c0_i32_0 : i32, i32
  }
  func.func @transform_4(%arg0: i32) -> (i32, i32) {
    %c0_i32 = arith.constant 0 : i32
    %c0_i32_0 = arith.constant 0 : i32
    %c0_i32_1 = arith.constant 0 : i32
    return %c0_i32, %c0_i32_0 : i32, i32
  }
  func.func @transform_5(%arg0: i32) -> (i32, i32, i32) {
    %c0_i32 = arith.constant 0 : i32
    %c0_i32_0 = arith.constant 0 : i32
    %c0_i32_1 = arith.constant 0 : i32
    %c0_i32_2 = arith.constant 0 : i32
    return %c0_i32, %c0_i32_0, %c0_i32_1 : i32, i32, i32
  }
  func.func @transform_6(%arg0: i32) -> (i32, i32) {
    %c0_i32 = arith.constant 0 : i32
    %c0_i32_0 = arith.constant 0 : i32
    %c0_i32_1 = arith.constant 0 : i32
    return %c0_i32, %c0_i32_0 : i32, i32
  }
  func.func @transform_7(%arg0: i32) -> (i32, i32) {
    %c0_i32 = arith.constant 0 : i32
    %c0_i32_0 = arith.constant 0 : i32
    %c0_i32_1 = arith.constant 0 : i32
    return %c0_i32, %c0_i32_0 : i32, i32
  }
  func.func @transform_8(%arg0: i32) -> (i32, i32) {
    %c0_i32 = arith.constant 0 : i32
    %c0_i32_0 = arith.constant 0 : i32
    %c0_i32_1 = arith.constant 0 : i32
    return %c0_i32, %c0_i32_0 : i32, i32
  }
  func.func @transform_9(%arg0: i32) -> (i32, i32) {
    %c0_i32 = arith.constant 0 : i32
    %c0_i32_0 = arith.constant 0 : i32
    %c0_i32_1 = arith.constant 0 : i32
    return %c0_i32, %c0_i32_0 : i32, i32
  }
  func.func @transform_10(%arg0: i32) -> (i32, i32) {
    %c0_i32 = arith.constant 0 : i32
    %c0_i32_0 = arith.constant 0 : i32
    %c0_i32_1 = arith.constant 0 : i32
    return %c0_i32, %c0_i32_0 : i32, i32
  }
  func.func @transform_11(%arg0: i32) -> (i32, i32) {
    %c0_i32 = arith.constant 0 : i32
    %c0_i32_0 = arith.constant 0 : i32
    %c0_i32_1 = arith.constant 0 : i32
    return %c0_i32, %c0_i32_0 : i32, i32
  }
  func.func @transform_12(%arg0: i32) -> (i32, i32, i32) {
    %c0_i32 = arith.constant 0 : i32
    %c0_i32_0 = arith.constant 0 : i32
    %c0_i32_1 = arith.constant 0 : i32
    %c0_i32_2 = arith.constant 0 : i32
    return %c0_i32, %c0_i32_0, %c0_i32_1 : i32, i32, i32
  }
  func.func @transform_13(%arg0: i32) -> (i32, i32) {
    %c0_i32 = arith.constant 0 : i32
    %c0_i32_0 = arith.constant 0 : i32
    %c0_i32_1 = arith.constant 0 : i32
    return %c0_i32, %c0_i32_0 : i32, i32
  }
  func.func @transform_14(%arg0: i32) -> (i32, i32) {
    %c0_i32 = arith.constant 0 : i32
    %c0_i32_0 = arith.constant 0 : i32
    %c0_i32_1 = arith.constant 0 : i32
    return %c0_i32, %c0_i32_0 : i32, i32
  }
  func.func @transform_15(%arg0: i32) -> (i32, i32) {
    %c0_i32 = arith.constant 0 : i32
    %c0_i32_0 = arith.constant 0 : i32
    %c0_i32_1 = arith.constant 0 : i32
    return %c0_i32, %c0_i32_0 : i32, i32
  }
  func.func @transform_16(%arg0: i32) -> (i32, i32, i32) {
    %c0_i32 = arith.constant 0 : i32
    %c0_i32_0 = arith.constant 0 : i32
    %c0_i32_1 = arith.constant 0 : i32
    return %arg0, %c0_i32, %c0_i32_0 : i32, i32, i32
  }
}

</mosaic_0001>

<bundles_post_ra>
// kernel: residual_block_pallas.1
= control target key start
LH: loop header
LB: loop body
LE: loop exit
PB: predicated region body
PF: predicated region fallthrough
CT: control target
= control target key end

     0   :  { %s1852_s21 = smov 0   ;;  %s2027_s0 = inlined_call_operand.vmem [shape: bf16[2,16,4], index: 0, kind: input, shape index: {}]   ;;  %s2028_s1 = inlined_call_operand.vmem [shape: f32[2,1,32], index: 1, kind: input, shape index: {}]   ;;  %s2029_s2 = inlined_call_operand.vmem [shape: f32[1,4], index: 2, kind: input, shape index: {}]   ;;  %s2030_s3 = inlined_call_operand.vmem [shape: f32[1,4], index: 3, kind: input, shape index: {}]   ;;  %s2031_s4 = inlined_call_operand.vmem [shape: f32[4,4], index: 4, kind: input, shape index: {}]   ;;  %s2032_s5 = inlined_call_operand.vmem [shape: bf16[3,4,8], index: 5, kind: input, shape index: {}]   ;;  %s2033_s6 = inlined_call_operand.vmem [shape: f32[1,8], index: 6, kind: input, shape index: {}]   ;;  %s2034_s7 = inlined_call_operand.vmem [shape: f32[32,8], index: 7, kind: input, shape index: {}]   ;;  %s2035_s8 = inlined_call_operand.vmem [shape: f32[1,8], index: 8, kind: input, shape index: {}]   ;;  %s2036_s9 = inlined_call_operand.vmem [shape: f32[1,8], index: 9, kind: input, shape index: {}]   ;;  %s2037_s10 = inlined_call_operand.vmem [shape: f32[1,8], index: 10, kind: input, shape index: {}]   ;;  %s2038_s11 = inlined_call_operand.vmem [shape: f32[8,8], index: 11, kind: input, shape index: {}]   ;;  %s2039_s12 = inlined_call_operand.vmem [shape: bf16[3,8,8], index: 12, kind: input, shape index: {}]   ;;  %s2040_s13 = inlined_call_operand.vmem [shape: f32[1,8], index: 13, kind: input, shape index: {}]   ;;  %s2041_s14 = inlined_call_operand.vmem [shape: bf16[4,8], index: 14, kind: input, shape index: {}]   ;;  %s2042_s15 = inlined_call_operand.vmem [shape: f32[1,8], index: 15, kind: input, shape index: {}]   ;;  %s2043_s16 = inlined_call_operand.vmem [shape: f32[2,16,8], index: 16, kind: output, shape index: {}]  }
   0x1   :  { %2044 = sst [smem:[#allocation2_spill]] %s2027_s0 }
   0x2 LB: > { %s1557_s22 = sadd.s32 4294967295, %s1762_s21   ;;  %p1561_p0 = scmp.ge.s32.totalorder %s1762_s21, 1  ;;  %s1762_s21 = sphi %s1852_s21, %s26_s21  }
   0x3   : > { %p470_p1 = scmp.lt.s32.totalorder %s1762_s21, 3 }
   0x5   : > { %p471_p2 = pnand %p1561_p0, %p470_p1 }
   0x6   : > { %v541_v0 = vld [vmem:[%s2031_s4] sm:$0xf] (!%p471_p2)  ;;  %vm559_vm0 = vcmask (!%p471_p2), 1043456   ;;  %p523_p3 = scmp.lt.s32.totalorder (!%p471_p2), %s1557_s22, 1  ;;  %v1764_v1 = vmov (!%p471_p2), 0.0   ;;  %vm1765_vm1 = vmmov (!%p471_p2), 0   ;;  %v633_v15 = vlaneseq (!%p471_p2) }
   0x7   : > { %474 = sbr.rel (%p471_p2) target bundleno = 1542 (0x606), region = 84  ;;  %1626 = vmatprep.subr.mxu0 (!%p471_p2), %v1764_v1  ;;  %1628 = vmatprep.mubr.msk.f32.mxu0 (!%p471_p2), %vm1765_vm1, %v1764_v1  ;;  %s2045_s28 = sld [smem:[#allocation2_spill]] (!%p471_p2)  ;;  %vm544_vm2 = vcmask (!%p471_p2), 31744   ;;  %v1573_v35 = vld [vmem:[%s2032_s5 + $0x2] sm:$0x3] (!%p471_p2)  ;;  %vm787_vm3 = vcmask (!%p471_p2), 1041408  }
   0x8   : > { %1627 = vmatpush3.msk.msra.mxu0 (!%p471_p2), %vm559_vm0, %v541_v0  ;;  %1631 = vmatprep.subr.mxu1 (!%p471_p2), %v1764_v1  ;;  %v634_v16 = vshrl.u32 (!%p471_p2), %v633_v15, 7  ;;  %v789_v36 = vsel (!%p471_p2), %vm787_vm3, %v1573_v35, 0  ;;  %v951_v41 = vld [vmem:[%s2034_s7] sm:$0xff] (!%p471_p2)  ;;  %v952_v42 = vld [vmem:[%s2034_s7 + $0x8] sm:$0xff] (!%p471_p2)  ;;  %v1766_v44 = vmov (!%p471_p2), 0.0|0.0   ;;  %v953_v45 = vld [vmem:[%s2034_s7 + $0x10] sm:$0xff] (!%p471_p2) }
   0x9   : > { %1632 = vmatpush3.msk.msra.mxu1 (!%p471_p2), %vm559_vm0, %v541_v0  ;;  %1633 = vmatprep.mubr.msk.f32.mxu1 (!%p471_p2), %vm1765_vm1, %v1764_v1  ;;  %v1700_v43 = vpack.c.bf16 (!%p471_p2), %v952_v42, %v951_v41  ;;  %v954_v46 = vld [vmem:[%s2034_s7 + $0x18] sm:$0xff] (!%p471_p2)  ;;  %vm956_vm4 = vcmask (!%p471_p2), 261120   ;;  %v542_v53 = vld [vmem:[%s2029_s2] sm:$0x1] (!%p471_p2)  ;;  %vm757_vm5 = vcmask (!%p471_p2), 1040384   ;;  %vm882_vm7 = vcmask (!%p471_p2), 1046528  }
   0xa   : > { %1636 = vmatprep.subr.bf16.mxu0 (!%p471_p2), %v1764_v1  ;;  %v1887_v17 = vsub.s32 (!%p471_p2), 0, %v634_v16  ;;  %1699 = vmatprep.subr.bf16.mxu1 (!%p471_p2), %v1766_v44  ;;  %v1703_v47 = vpack.c.bf16 (!%p471_p2), %v954_v46, %v953_v45  ;;  %v1570_v57 = vld [vmem:[%s2030_s3] ss:$0 sm:$0xff] (!%p471_p2)  ;;  %vm771_vm6 = vsmask.f32 (!%p471_p2), 7424  ;;  %vm1039_vm8 = vcmask (!%p471_p2), 64512  }
   0xe   : > { %s2047_s22 = smov (!%p523_p3, %s1557_s22), 1 }
   0xf   : > { %s1597_s25 = sshll.u32 %s2047_s22, 3  ;;  %s530_s19 = scalar_lea.vmem %s2028_s1, %s2047_s22 }
  0x10   : > { %s527_s29 = scalar_lea.vmem %s2045_s28, %s1597_s25  ;;  %v943_v37 = vld [vmem:[%s530_s19] sm:$0x1]  ;;  %s1598_s19 = sshll.u32 %s2047_s22, 4 }
  0x11   : > { %v1878_v2 = vld [vmem:[%s527_s29] sm:$0xff]   ;;  %v1579_v38 = vmul.f32 -1.442695, %v943_v37  ;;  %s535_s24 = scalar_lea.vmem %s2043_s16, %s1598_s19 }
  0x12   : > { %v539_v3 = vunpack.c.l.bf16 %v1878_v2  ;;  %v540_v4 = vunpack.c.h.bf16 %v1878_v2 }
  0x13   : > { %1732 = vpow2.f32 %v1579_v38 }
  0x14   : > { %v545_v5 = vsel %vm544_vm2, %v539_v3, 0.0  ;;  %v546_v6 = vsel %vm544_vm2, %v540_v4, 0.0 }
  0x15   : > { %v547_v7 = vadd.f32 %v546_v6, %v545_v5 }
  0x17   : > { %v548_v8 = vrot.slane %v547_v7, 4 }
  0x19   : > { %v549_v9 = vadd.f32 %v548_v8, %v547_v7 }
  0x1b   : > { %v550_v10 = vrot.slane %v549_v9, 2 }
  0x1d   : > { %v551_v11 = vadd.f32 %v550_v10, %v549_v9  ;;  %v1733_v39 = vpop.eup %1732 }
  0x1e   : > { %v947_v40 = vadd.f32 1.0, %v1733_v39 }
  0x1f   : > { %v552_v12 = vrot.slane %v551_v11, 1 }
  0x20   : > { %1734 = vrcp.f32 %v947_v40 }
  0x21   : > { %v553_v13 = vadd.f32 %v552_v12, %v551_v11 }
  0x23   : > { %v555_v14 = vmul.f32 0.0625, %v553_v13 }
  0x25   : > { %1629 = vmatmul.mubr.msk.f32.vlgmr.msra.gmra.mrb[0].mxu0 %vm544_vm2, %v555_v14 }
  0x26   : > { %1638 = vmatprep.mubr.msk.bf16.mxu0 %vm1765_vm1, %v1764_v1  ;;  %1637 = vmatpush3.bf16.msra.mxu0 %v789_v36 }
  0x27   : > { %1642 = vmatprep.subr.bf16.mxu0 %v1764_v1 }
  0x2a   : > { %v1735_v48 = vpop.eup %1734 }
  0x2b   : > { %v950_v49 = vmul.f32 %v1735_v48, %v943_v37 }
  0xf8   : > { %v629_v18 = vpop.f32.mrb[0].mxu0 }
  0xf9   : > { %v636_v19 = vrot.slane %v629_v18, %v1887_v17  ;;  %v1630_v20 = vpop.f32.mrb[1].mxu0 }
  0xfb   : > { %v637_v21 = vsub.f32 %v539_v3, %v636_v19  ;;  %v638_v22 = vsub.f32 %v540_v4, %v636_v19 }
  0xfd   : > { %v639_v23 = vmul.f32 %v637_v21, %v637_v21  ;;  %v640_v24 = vmul.f32 %v638_v22, %v638_v22 }
  0xff   : > { %v641_v25 = vsel %vm544_vm2, %v639_v23, 0.0  ;;  %v642_v26 = vsel %vm544_vm2, %v640_v24, 0.0 }
 0x100   : > { %v643_v27 = vadd.f32 %v642_v26, %v641_v25 }
 0x102   : > { %v644_v28 = vrot.slane %v643_v27, 4 }
 0x104   : > { %v645_v29 = vadd.f32 %v644_v28, %v643_v27  ;;  %v1576_v27 = vld [vmem:[%s2032_s5 + $0x4] sm:$0x3] }
 0x105   : > { %v890_v28 = vsel %vm787_vm3, %v1576_v27, 0  ;;  %v1586_v27 = vld [vmem:[%s2039_s12 + $0x4] sm:$0xf] }
 0x106   : > { %v646_v30 = vrot.slane %v645_v29, 2 }
 0x108   : > { %v647_v31 = vadd.f32 %v646_v30, %v645_v29 }
 0x10a   : > { %v648_v32 = vrot.slane %v647_v31, 1 }
 0x10c   : > { %v649_v33 = vadd.f32 %v648_v32, %v647_v31 }
 0x10e   : > { %v650_v34 = vmul.f32 0.0625, %v649_v33 }
 0x110   : > { %1634 = vmatmul.mubr.msk.f32.vlgmr.msra.gmra.mrb[0].mxu1 %vm544_vm2, %v650_v34  ;;  %v1036_v34 = vld [vmem:[%s2038_s11] sm:$0xff] }
 0x111   : > { %1662 = vmatprep.mubr.msk.f32.mxu1 %vm1765_vm1, %v1764_v1  ;;  %1701 = vmatpush3.bf16.msra.mxu1 %v1700_v43  ;;  %v955_v43 = vld [vmem:[%s2035_s8] sm:$0x1] }
 0x112   : > { %1702 = vmatprep.subr.bf16.mxu1 %v1766_v44 }
 0x115   : > { %1704 = vmatpush3.bf16.msra.mxu1 %v1703_v47  ;;  %v1578_v47 = vld [vmem:[%s2033_s6] ss:$0 sm:$0xff] }
 0x116   : > { %1665 = vmatprep.subr.mxu1 %v1764_v1 }
 0x118   : > { %1663 = vmatmul.mubr.msk.f32.vlgmr.msra.gmra.mrb[2].mxu1 %vm956_vm4, %v950_v49 }
 0x119   : > { %1667 = vmatprep.mubr.msk.f32.mxu1 %vm1765_vm1, %v1764_v1  ;;  %1666 = vmatpush3.msra.mxu1 %v1036_v34 }
 0x11a   : > { %1681 = vmatprep.subr.bf16.mxu1 %v1764_v1 }
 0x1e3   : > { %v720_v50 = vpop.f32.mrb[0].mxu1 }
 0x1e4   : > { %v721_v51 = vadd.f32 1e-05, %v720_v50  ;;  %v1635_v52 = vpop.f32.mrb[1].mxu1 }
 0x1e6   : > { %1736 = vrsqrt.f32 %v721_v51 }
 0x1eb   : > { %v1026_v32 = vpop.f32.mrb[2].mxu1 }
 0x1ec   : > { %v1664_v33 = vpop.f32.mrb[3].mxu1  ;;  %v1027_v46 = vadd.f32 %v1026_v32, %v955_v43  ;;  %v1037_v32 = vld [vmem:[%s2036_s9] sm:$0x1] }
 0x1ee   : > { %v1033_v50 = vrot.slane %v1027_v46, %v1887_v17 }
 0x1f0   : > { %v1737_v54 = vpop.eup %1736 }
 0x1f1   : > { %v725_v55 = vmul.f32 %v1737_v54, %v542_v53 }
 0x1f3   : > { %v729_v56 = vrot.slane %v725_v55, %v1887_v17 }
 0x1f5   : > { %v730_v58 = vmul.f32 %v729_v56, %v637_v21  ;;  %v731_v59 = vmul.f32 %v729_v56, %v638_v22  ;;  %v767_v22 = vld [vmem:[%s2032_s5] sm:$0x3] }
 0x1f6   : > { %v835_v25 = vsel %vm787_vm3, %v767_v22, 0 }
 0x1f7   : > { %v738_v60 = vadd.f32 %v1570_v57, %v730_v58  ;;  %v739_v61 = vadd.f32 %v1570_v57, %v731_v59 }
 0x1f9   : > { %v1571_v62 = vmul.f32 -1.442695, %v738_v60  ;;  %v1572_v63 = vmul.f32 -1.442695, %v739_v61 }
 0x1fb   : > { %1738 = vpow2.f32 %v1571_v62 }
 0x1fc   : > { %1740 = vpow2.f32 %v1572_v63 }
 0x205   : > { %v1739_v0 = vpop.eup %1738 }
 0x206   : > { %v1741_v3 = vpop.eup %1740  ;;  %v746_v4 = vadd.f32 1.0, %v1739_v0 }
 0x207   : > { %v747_v5 = vadd.f32 1.0, %v1741_v3 }
 0x208   : > { %1742 = vrcp.f32 %v746_v4 }
 0x209   : > { %1744 = vrcp.f32 %v747_v5 }
 0x212   : > { %v1743_v6 = vpop.eup %1742 }
 0x213   : > { %v1745_v7 = vpop.eup %1744  ;;  %v752_v8 = vmul.f32 %v1743_v6, %v738_v60 }
 0x214   : > { %v753_v9 = vmul.f32 %v1745_v7, %v739_v61 }
 0x215   : > { %v758_v10 = vrot.slane %v752_v8, 7 }
 0x216   : > { %v759_v11 = vrot.slane %v753_v9, 7 }
 0x217   : > { %v764_v12 = vsel %vm757_vm5, 0.0, %v758_v10 }
 0x218   : > { %v760_v13 = vsel %vm757_vm5, %v758_v10, %v759_v11  ;;  %v765_v14 = vsel %vm757_vm5, %v759_v11, 0.0 }
 0x219   : > { %v766_v15 = vpack.c.bf16 %v760_v13, %v764_v12  ;;  %v768_v16 = vpack.c.bf16 %v765_v14, %v765_v14 }
 0x21b   : > { %v775_v18 = vshll.u32 %v766_v15, 16  ;;  %v780_v19 = vshll.u32 %v768_v16, 16  ;;  %v773_v20 = vshrl.u32 %v766_v15, 16  ;;  %v883_v29 = vrot.slane %v766_v15, 1 }
 0x21c   : > { %v884_v30 = vrot.slane %v768_v16, 1 }
 0x21d   : > { %v777_v21 = vrot.slane %v775_v18, 1  ;;  %v782_v24 = vrot.slane %v780_v19, 1 }
 0x21e   : > { %v885_v31 = vsel %vm882_vm7, %v883_v29, %v884_v30 }
 0x21f   : > { %v778_v23 = vor.u32 %v777_v21, %v773_v20 }
 0x221   : > { %v783_v26 = vsel %vm771_vm6, %v778_v23, %v782_v24 }
 0x222   : > { %1639 = vmatmul.mubr.msk.bf16.vlgmr.msra.gmra.mrb[4].mxu0 %vm544_vm2, %v783_v26 }
 0x223   : > { %1643 = vmatpush3.bf16.msra.mxu0 %v835_v25  ;;  %1644 = vmatprep.mubr.msk.bf16.mxu0 %vm1765_vm1, %v1764_v1  ;;  %v1256_v25 = vld [vmem:[%s2039_s12] sm:$0xf] }
 0x224   : > { %1648 = vmatprep.subr.bf16.mxu0 %v1764_v1  ;;  %v1322_v26 = vsel %vm559_vm0, %v1256_v25, 0 }
 0x22a   : > { %1645 = vmatmul.mubr.msk.bf16.vlgmr.msra.gmra.mrb[8].mxu0 %vm544_vm2, %v766_v15 }
 0x22b   : > { %1649 = vmatpush3.bf16.msra.mxu0 %v890_v28  ;;  %1650 = vmatprep.mubr.msk.bf16.mxu0 %vm1765_vm1, %v1764_v1  ;;  %v1276_v28 = vsel %vm559_vm0, %v1586_v27, 0 }
 0x22c   : > { %1670 = vmatprep.subr.mxu0 %v1764_v1 }
 0x232   : > { %1651 = vmatmul.mubr.msk.bf16.vlgmr.msra.gmra.mrb[12].mxu0 %vm544_vm2, %v885_v31 }
 0x233   : > { %1672 = vmatprep.mubr.msk.f32.mxu0 %vm1765_vm1, %v1764_v1  ;;  %1671 = vmatpush3.msra.mxu0 %v1036_v34 }
 0x234   : > { %1675 = vmatprep.subr.bf16.mxu0 %v1764_v1 }
 0x2f5   : > { %v825_v35 = vpop.f32.mrb[4].mxu0 }
 0x2f6   : > { %v1640_v36 = vpop.f32.mrb[5].mxu0 }
 0x2f7   : > { %v828_v37 = vpop.f32.mrb[6].mxu0  ;;  %v1583_v36 = vld [vmem:[%s2037_s10] ss:$0 sm:$0xff] }
 0x2f8   : > { %v1641_v38 = vpop.f32.mrb[7].mxu0 }
 0x2fd   : > { %v871_v39 = vpop.f32.mrb[8].mxu0 }
 0x2fe   : > { %v872_v40 = vadd.f32 %v871_v39, %v825_v35  ;;  %v1646_v41 = vpop.f32.mrb[9].mxu0 }
 0x2ff   : > { %v874_v42 = vpop.f32.mrb[10].mxu0 }
 0x300   : > { %v875_v44 = vadd.f32 %v874_v42, %v828_v37  ;;  %v1647_v45 = vpop.f32.mrb[11].mxu0 }
 0x305   : > { %v926_v48 = vpop.f32.mrb[12].mxu0 }
 0x306   : > { %v933_v49 = vadd.f32 %v926_v48, %v872_v40  ;;  %v1652_v51 = vpop.f32.mrb[13].mxu0 }
 0x307   : > { %v929_v52 = vpop.f32.mrb[14].mxu0 }
 0x308   : > { %v941_v53 = vadd.f32 %v1578_v47, %v933_v49  ;;  %v934_v54 = vadd.f32 %v929_v52, %v875_v44  ;;  %v1653_v55 = vpop.f32.mrb[15].mxu0  ;;  %v1589_v52 = vld [vmem:[%s2039_s12 + $0x8] sm:$0xf] }
 0x30a   : > { %v1034_v56 = vadd.f32 %v1033_v50, %v941_v53  ;;  %v942_v57 = vadd.f32 %v1578_v47, %v934_v54 }
 0x30c   : > { %v1035_v58 = vadd.f32 %v1033_v50, %v942_v57  ;;  %v1040_v59 = vsel %vm1039_vm8, %v1034_v56, 0.0 }
 0x30e   : > { %v1041_v60 = vsel %vm1039_vm8, %v1035_v58, 0.0 }
 0x30f   : > { %v1042_v61 = vadd.f32 %v1041_v60, %v1040_v59 }
 0x311   : > { %v1043_v62 = vrot.slane %v1042_v61, 4 }
 0x313   : > { %v1044_v63 = vadd.f32 %v1043_v62, %v1042_v61 }
 0x315   : > { %v1045_v0 = vrot.slane %v1044_v63, 2 }
 0x317   : > { %v1046_v3 = vadd.f32 %v1045_v0, %v1044_v63 }
 0x319   : > { %v1047_v4 = vrot.slane %v1046_v3, 1 }
 0x31b   : > { %v1048_v5 = vadd.f32 %v1047_v4, %v1046_v3 }
 0x31d   : > { %v1049_v6 = vmul.f32 0.0625, %v1048_v5 }
 0x31f   : > { %1668 = vmatmul.mubr.msk.f32.vlgmr.msra.gmra.mrb[4].mxu1 %vm1039_vm8, %v1049_v6  ;;  %v1429_v6 = vld [vmem:[%s2041_s14] sm:$0x3] }
 0x320   : > { %1683 = vmatprep.mubr.msk.bf16.mxu1 %vm1765_vm1, %v1764_v1  ;;  %1682 = vmatpush3.bf16.msra.mxu1 %v1322_v26 }
 0x321   : > { %1687 = vmatprep.subr.bf16.mxu1 %v1764_v1 }
 0x3f2   : > { %v1119_v7 = vpop.f32.mrb[4].mxu1 }
 0x3f3   : > { %v1126_v8 = vrot.slane %v1119_v7, %v1887_v17  ;;  %v1669_v9 = vpop.f32.mrb[5].mxu1  ;;  %v1446_v7 = vsel %vm787_vm3, %v1429_v6, 0 }
 0x3f5   : > { %v1127_v10 = vsub.f32 %v1034_v56, %v1126_v8  ;;  %v1128_v11 = vsub.f32 %v1035_v58, %v1126_v8  ;;  %v1376_v58 = vsel %vm559_vm0, %v1589_v52, 0 }
 0x3f7   : > { %v1129_v12 = vmul.f32 %v1127_v10, %v1127_v10  ;;  %v1130_v13 = vmul.f32 %v1128_v11, %v1128_v11 }
 0x3f9   : > { %v1131_v14 = vsel %vm1039_vm8, %v1129_v12, 0.0  ;;  %v1132_v15 = vsel %vm1039_vm8, %v1130_v13, 0.0  ;;  %v1591_v13 = vld [vmem:[%s2040_s13] ss:$0 sm:$0xff] }
 0x3fa   : > { %v1133_v16 = vadd.f32 %v1132_v15, %v1131_v14  ;;  %v1592_v15 = vld [vmem:[%s2042_s15] ss:$0 sm:$0xff] }
 0x3fc   : > { %v1134_v18 = vrot.slane %v1133_v16, 4 }
 0x3fe   : > { %v1135_v19 = vadd.f32 %v1134_v18, %v1133_v16 }
 0x400   : > { %v1136_v20 = vrot.slane %v1135_v19, 2 }
 0x402   : > { %v1137_v21 = vadd.f32 %v1136_v20, %v1135_v19 }
 0x404   : > { %v1138_v22 = vrot.slane %v1137_v21, 1 }
 0x406   : > { %v1139_v23 = vadd.f32 %v1138_v22, %v1137_v21 }
 0x408   : > { %v1140_v24 = vmul.f32 0.0625, %v1139_v23 }
 0x40a   : > { %1673 = vmatmul.mubr.msk.f32.vlgmr.msra.gmra.mrb[2].mxu0 %vm1039_vm8, %v1140_v24 }
 0x40b   : > { %1677 = vmatprep.mubr.msk.bf16.mxu0 %vm1765_vm1, %v1764_v1  ;;  %1676 = vmatpush3.bf16.msra.mxu0 %v1276_v28 }
 0x4dd   : > { %v1210_v29 = vpop.f32.mrb[2].mxu0 }
 0x4de   : > { %v1211_v30 = vadd.f32 1e-05, %v1210_v29  ;;  %v1674_v31 = vpop.f32.mrb[3].mxu0 }
 0x4e0   : > { %1746 = vrsqrt.f32 %v1211_v30 }
 0x4ea   : > { %v1747_v33 = vpop.eup %1746 }
 0x4eb   : > { %v1215_v34 = vmul.f32 %v1747_v33, %v1037_v32 }
 0x4ed   : > { %v1219_v35 = vrot.slane %v1215_v34, %v1887_v17 }
 0x4ef   : > { %v1220_v37 = vmul.f32 %v1219_v35, %v1127_v10  ;;  %v1221_v38 = vmul.f32 %v1219_v35, %v1128_v11 }
 0x4f1   : > { %v1229_v39 = vadd.f32 %v1583_v36, %v1221_v38  ;;  %v1228_v40 = vadd.f32 %v1583_v36, %v1220_v37 }
 0x4f3   : > { %v1585_v41 = vmul.f32 -1.442695, %v1229_v39  ;;  %v1584_v42 = vmul.f32 -1.442695, %v1228_v40 }
 0x4f5   : > { %1748 = vpow2.f32 %v1585_v41 }
 0x4f6   : > { %1750 = vpow2.f32 %v1584_v42 }
 0x4ff   : > { %v1749_v43 = vpop.eup %1748 }
 0x500   : > { %v1751_v44 = vpop.eup %1750  ;;  %v1237_v45 = vadd.f32 1.0, %v1749_v43 }
 0x501   : > { %v1236_v46 = vadd.f32 1.0, %v1751_v44 }
 0x502   : > { %1752 = vrcp.f32 %v1237_v45 }
 0x503   : > { %1754 = vrcp.f32 %v1236_v46 }
 0x50c   : > { %v1753_v47 = vpop.eup %1752 }
 0x50d   : > { %v1755_v17 = vpop.eup %1754  ;;  %v1243_v48 = vmul.f32 %v1753_v47, %v1229_v39 }
 0x50e   : > { %v1242_v49 = vmul.f32 %v1755_v17, %v1228_v40 }
 0x50f   : > { %v1248_v50 = vrot.slane %v1243_v48, 7 }
 0x510   : > { %v1247_v51 = vrot.slane %v1242_v49, 7 }
 0x511   : > { %v1254_v53 = vsel %vm757_vm5, %v1248_v50, 0.0 }
 0x512   : > { %v1249_v54 = vsel %vm757_vm5, %v1247_v51, %v1248_v50  ;;  %v1253_v55 = vsel %vm757_vm5, 0.0, %v1247_v51  ;;  %v1257_v56 = vpack.c.bf16 %v1254_v53, %v1254_v53 }
 0x513   : > { %v1255_v57 = vpack.c.bf16 %v1249_v54, %v1253_v55 }
 0x514   : > { %v1268_v60 = vshll.u32 %v1257_v56, 16  ;;  %v1370_v5 = vrot.slane %v1257_v56, 1 }
 0x515   : > { %1684 = vmatmul.mubr.msk.bf16.vlgmr.msra.gmra.mrb[8].mxu1 %vm1039_vm8, %v1255_v57  ;;  %v1263_v59 = vshll.u32 %v1255_v57, 16  ;;  %v1261_v61 = vshrl.u32 %v1255_v57, 16  ;;  %v1369_v4 = vrot.slane %v1255_v57, 1 }
 0x516   : > { %1688 = vmatpush3.bf16.msra.mxu1 %v1376_v58  ;;  %1689 = vmatprep.mubr.msk.bf16.mxu1 %vm1765_vm1, %v1764_v1  ;;  %v1270_v0 = vrot.slane %v1268_v60, 1 }
 0x517   : > { %v1265_v62 = vrot.slane %v1263_v59, 1  ;;  %1693 = vmatprep.subr.bf16.mxu1 %v1764_v1  ;;  %v1371_v8 = vsel %vm882_vm7, %v1369_v4, %v1370_v5 }
 0x519   : > { %v1266_v63 = vor.u32 %v1265_v62, %v1261_v61 }
 0x51b   : > { %v1271_v3 = vsel %vm771_vm6, %v1266_v63, %v1270_v0 }
 0x51c   : > { %1678 = vmatmul.mubr.msk.bf16.vlgmr.msra.gmra.mrb[16].mxu0 %vm1039_vm8, %v1271_v3 }
 0x521   : > { %1690 = vmatmul.mubr.msk.bf16.vlgmr.msra.gmra.mrb[8].mxu1 %vm1039_vm8, %v1371_v8 }
 0x522   : > { %1694 = vmatpush3.bf16.msra.mxu1 %v1446_v7  ;;  %1695 = vmatprep.mubr.msk.bf16.mxu1 %vm1765_vm1, %v1764_v1 }
 0x52d   : > { %1696 = vmatmul.mubr.msk.bf16.vlgmr.msra.gmra.mrb[8].mxu1 %vm544_vm2, %v1878_v2 }
 0x5ef   : > { %v1312_v9 = vpop.f32.mrb[16].mxu0 }
 0x5f0   : > { %v1679_v10 = vpop.f32.mrb[17].mxu0  ;;  %v1705_v14 = vadd.f32 %v1591_v13, %v1312_v9 }
 0x5f1   : > { %v1315_v11 = vpop.f32.mrb[18].mxu0 }
 0x5f2   : > { %v1680_v12 = vpop.f32.mrb[19].mxu0  ;;  %v1708_v16 = vadd.f32 %v1591_v13, %v1315_v11  ;;  %v1706_v18 = vadd.f32 %v1705_v14, %v1592_v15 }
 0x5f4   : > { %v1709_v20 = vadd.f32 %v1708_v16, %v1592_v15 }
 0x600   : > { %v1482_v1 = vpop.f32.mrb[8].mxu1 }
 0x601   : > { %v1707_v2 = vadd.f32 %v1706_v18, %v1482_v1  ;;  %v1697_v19 = vpop.f32.mrb[9].mxu1 }
 0x602   : > { %v1485_v21 = vpop.f32.mrb[10].mxu1 }
 0x603   : > { %1491 = vst.msk [vmem:[%s535_s24] sm:$0xff] %vm1039_vm8, %v1707_v2  ;;  %v1710_v22 = vadd.f32 %v1709_v20, %v1485_v21  ;;  %v1698_v23 = vpop.f32.mrb[11].mxu1 }
 0x605   : > { %1492 = vst.msk [vmem:[%s535_s24 + $0x8] sm:$0xff] %vm1039_vm8, %v1710_v22 }
 0x606 PF: > { %s26_s21 = sadd.s32 1, %s1762_s21  }
 0x607   : > { %p23_p4 = scmp.ge.s32.totalorder %s26_s21, 4  }
 0x609   :  { %25 = sbr.rel (!%p23_p4) target bundleno = 2 (0x2), region = 121 }

</bundles_post_ra>
